<compile_context>
chip_gen: v7x
topology: tpu7x:2x2x1
jax: 0.10.0
libtpu: 0.0.40
codegen_flags: <defaults>
</compile_context>

<pallas_src>
import math
from functools import partial

import jax
import jax.numpy as jnp
from jax.experimental import pallas as pl
from jax.experimental.pallas import tpu as pltpu


COMPUTE_DTYPE = jnp.bfloat16
_VMEM_LIMIT = 32 * 1024 * 1024  # explicit scoped-VMEM limit (v5e default is 16 MiB)


def _pick_m_tile(n):
    """Largest M tile (multiple of 16 for bf16 sublanes) dividing n, preferring
    >= 2 grid steps so both v7x TensorCores get work."""
    tm = n
    for c in (512, 256, 128, 64, 32, 16):
        if n % c == 0:
            tm = c
            break
    if n // tm < 2 and tm % 2 == 0 and (tm // 2) % 16 == 0:
        tm //= 2
    return tm


# ---------------------------------------------------------------------------
# Resident-weight linear: y = x @ Wt [+ b] [+ residual]
# ---------------------------------------------------------------------------
def _linear_kernel(x_ref, wt_ref, *rest, has_bias, has_res):
    o_ref = rest[-1]
    acc = jnp.dot(x_ref[...], wt_ref[...], preferred_element_type=jnp.float32)
    i = 0
    if has_bias:
        acc = acc + rest[i][...]           # f32 bias
        i += 1
    if has_res:
        acc = acc + rest[i][...].astype(jnp.float32)
        i += 1
    o_ref[...] = acc.astype(o_ref.dtype)


def pallas_linear(x, wt, bias=None, residual=None):
    """x: (N, Cin) bf16, wt: (Cin, Cout) bf16 (pre-transposed, resident in VMEM),
    bias: (1, Cout) f32 or None, residual: (N, Cout) bf16 or None."""
    n, cin = x.shape
    cout = wt.shape[1]
    tm = _pick_m_tile(n)
    grid = (n // tm,)

    in_specs = [pl.BlockSpec((tm, cin), lambda i: (i, 0)),
                pl.BlockSpec((cin, cout), lambda i: (0, 0))]   # resident weight
    args = [x, wt]
    if bias is not None:
        in_specs.append(pl.BlockSpec((1, cout), lambda i: (0, 0)))
        args.append(bias.reshape(1, cout).astype(jnp.float32))
    if residual is not None:
        in_specs.append(pl.BlockSpec((tm, cout), lambda i: (i, 0)))
        args.append(residual)

    return pl.pallas_call(
        partial(_linear_kernel, has_bias=bias is not None,
                has_res=residual is not None),
        out_shape=jax.ShapeDtypeStruct((n, cout), x.dtype),
        grid=grid,
        in_specs=in_specs,
        out_specs=pl.BlockSpec((tm, cout), lambda i: (i, 0)),
        compiler_params=pltpu.CompilerParams(
            dimension_semantics=("parallel",),
            vmem_limit_bytes=_VMEM_LIMIT),
    )(*args)


# ---------------------------------------------------------------------------
# Fused MHA core + out-projection + residual (one batch element per grid step)
# ---------------------------------------------------------------------------
def _attn_outproj_kernel(qkv_ref, wo_ref, bo_ref, r_ref, o_ref, acc_ref,
                         *, num_heads, c2):
    # TODO(synk): switch to an online-softmax/flash formulation (KV grid axis,
    # running m/l/acc) before targeting very large S on v7x's 64 MiB VMEM; the
    # full (S, S) score matrix is materialized per head here.
    qkv = qkv_ref[...]                      # (S, 3*c2) bf16, this batch element
    dh = c2 // num_heads
    for h in range(num_heads):              # static -> unrolled
        qh = qkv[:, h * dh:(h + 1) * dh]                     # (S, dh) (scale folded in)
        kh = qkv[:, c2 + h * dh:c2 + (h + 1) * dh]           # (S, dh)
        vh = qkv[:, 2 * c2 + h * dh:2 * c2 + (h + 1) * dh]   # (S, dh)
        # q @ k^T without an explicit transpose ("nt" form), f32 accumulation
        s = jax.lax.dot_general(qh, kh, (((1,), (1,)), ((), ())),
                                preferred_element_type=jnp.float32)
        m = jnp.max(s, axis=-1, keepdims=True)
        p = jnp.exp(s - m)
        l = jnp.sum(p, axis=-1, keepdims=True)
        oh = jnp.dot(p.astype(qkv.dtype), vh, preferred_element_type=jnp.float32)
        # deferred normalization: S x dh multiply instead of S x S; EUP reciprocal
        acc_ref[:, h * dh:(h + 1) * dh] = oh * pl.reciprocal(l, approx=True)
    # fused out-projection + bias + residual (resident (c2, c2) weight)
    attn = acc_ref[...].astype(qkv.dtype)
    y = jnp.dot(attn, wo_ref[...], preferred_element_type=jnp.float32)
    o_ref[...] = (y + bo_ref[...] + r_ref[...].astype(jnp.float32)).astype(o_ref.dtype)


def pallas_mha_outproj(qkv, residual, wt_out, b_out, B, S, c2, num_heads):
    """qkv: (B*S, 3*c2) bf16 batch-major rows; residual: (B*S, c2) bf16.
    Returns out_proj(MHA(qkv)) + residual, shape (B*S, c2) bf16."""
    return pl.pallas_call(
        partial(_attn_outproj_kernel, num_heads=num_heads, c2=c2),
        out_shape=jax.ShapeDtypeStruct((B * S, c2), qkv.dtype),
        grid=(B,),
        in_specs=[
            pl.BlockSpec((S, 3 * c2), lambda b: (b, 0)),
            pl.BlockSpec((c2, c2), lambda b: (0, 0)),     # resident out-proj weight
            pl.BlockSpec((1, c2), lambda b: (0, 0)),      # resident out-proj bias
            pl.BlockSpec((S, c2), lambda b: (b, 0)),      # residual
        ],
        out_specs=pl.BlockSpec((S, c2), lambda b: (b, 0)),
        scratch_shapes=[pltpu.VMEM((S, c2), jnp.float32)],
        compiler_params=pltpu.CompilerParams(
            dimension_semantics=("parallel",),
            vmem_limit_bytes=_VMEM_LIMIT),
    )(qkv, wt_out, b_out, residual)


# ---------------------------------------------------------------------------
# 1x1 grouped conv (as a block-diagonal matmul) + fused BN + SiLU, row-major out
# ---------------------------------------------------------------------------
def _conv_bn_silu_kernel(x_ref, w_ref, s_ref, t_ref, o_ref):
    y = jnp.dot(x_ref[...], w_ref[...], preferred_element_type=jnp.float32)
    y = y * s_ref[...] + t_ref[...]                     # fused BN (f32)
    o_ref[...] = (y * jax.nn.sigmoid(y)).astype(o_ref.dtype)   # SiLU


def pallas_conv_bn_silu(x_rows, wbd, scale, shift):
    """x_rows: (B*HW, C1) bf16 row-major; wbd: (C1, C2) bf16 block-diagonal
    (exactly equivalent to the 1x1 grouped conv); scale/shift: (1, C2) f32."""
    n, c1 = x_rows.shape
    c2 = wbd.shape[1]
    tm = _pick_m_tile(n)
    return pl.pallas_call(
        _conv_bn_silu_kernel,
        out_shape=jax.ShapeDtypeStruct((n, c2), x_rows.dtype),
        grid=(n // tm,),
        in_specs=[
            pl.BlockSpec((tm, c1), lambda i: (i, 0)),
            pl.BlockSpec((c1, c2), lambda i: (0, 0)),    # resident weight
            pl.BlockSpec((1, c2), lambda i: (0, 0)),
            pl.BlockSpec((1, c2), lambda i: (0, 0)),
        ],
        out_specs=pl.BlockSpec((tm, c2), lambda i: (i, 0)),
        compiler_params=pltpu.CompilerParams(
            dimension_semantics=("parallel",),
            vmem_limit_bytes=_VMEM_LIMIT),
    )(x_rows, wbd, scale, shift)


# ---------------------------------------------------------------------------
# Parameter init (deterministic, synthetic; mirrors the PyTorch module layout)
# ---------------------------------------------------------------------------
def _nrm(key, shape, scale=0.1):
    return scale * jax.random.normal(key, shape, jnp.float32)


def init_params(key, c1, c2, num_heads, num_layers):
    ks = iter(jax.random.split(key, 64))
    params = {"c2": c2}
    if c1 != c2:
        g = math.gcd(c1, c2)
        params["conv"] = {
            "groups": g,
            "w": _nrm(next(ks), (c2, c1 // g, 1, 1), 0.3),
            "gamma": 1.0 + _nrm(next(ks), (c2,), 0.05),
            "beta": _nrm(next(ks), (c2,), 0.05),
            "mean": _nrm(next(ks), (c2,), 0.05),
            "var": 1.0 + jnp.abs(_nrm(next(ks), (c2,), 0.05)),
        }
    params["lin_w"] = _nrm(next(ks), (c2, c2))
    params["lin_b"] = _nrm(next(ks), (c2,))
    layers = []
    for _ in range(num_layers):
        layers.append({
            "wq": _nrm(next(ks), (c2, c2)),
            "wk": _nrm(next(ks), (c2, c2)),
            "wv": _nrm(next(ks), (c2, c2)),
            "in_proj_w": _nrm(next(ks), (3 * c2, c2)),
            "in_proj_b": _nrm(next(ks), (3 * c2,)),
            "out_w": _nrm(next(ks), (c2, c2)),
            "out_b": _nrm(next(ks), (c2,)),
            "w_fc1": _nrm(next(ks), (c2, c2)),
            "w_fc2": _nrm(next(ks), (c2, c2)),
        })
    params["layers"] = layers
    return params


def fold_params(params, num_heads):
    """One-time host-side folding (all exact up to fp rounding):
      * BN -> scale/shift (inference running stats),
      * grouped 1x1 conv -> block-diagonal dense weight,
      * q/k/v linears composed into the MHA in-projection,
      * 1/sqrt(dh) folded into the Q block of the fused QKV weight/bias,
      * fc2 @ fc1 pre-multiplied,
      * weights pre-transposed and stored in bf16; biases/BN stay f32."""
    c2 = params["c2"]
    dh = c2 // num_heads
    scale = 1.0 / math.sqrt(dh)
    folded = {"c2": c2}

    if "conv" in params:
        conv = params["conv"]
        g = conv["groups"]
        w2d = conv["w"][:, :, 0, 0]                       # (c2, cin_g)
        cin_g = w2d.shape[1]
        cout_g = c2 // g
        c1 = cin_g * g
        # block-diagonal (C1, C2) weight: exact equivalent of the grouped conv
        w_g = w2d.reshape(g, cout_g, cin_g).transpose(0, 2, 1)  # (g, cin_g, cout_g)
        wbd = (jnp.eye(g, dtype=w_g.dtype)[:, None, :, None]
               * w_g[:, :, None, :]).reshape(c1, c2)
        # TODO(synk): BatchNorm folded in inference mode (running stats); training-mode batch stats not reproduced.
        bn_scale = conv["gamma"] / jnp.sqrt(conv["var"] + 1e-5)
        bn_shift = conv["beta"] - conv["mean"] * bn_scale
        folded["conv"] = {
            "wbd": wbd.astype(COMPUTE_DTYPE),
            "scale": bn_scale.reshape(1, c2).astype(jnp.float32),
            "shift": bn_shift.reshape(1, c2).astype(jnp.float32),
        }

    folded["lin_wt"] = params["lin_w"].T.astype(COMPUTE_DTYPE)
    folded["lin_b"] = params["lin_b"].reshape(1, c2).astype(jnp.float32)

    layers = []
    for layer in params["layers"]:
        wi, bi = layer["in_proj_w"], layer["in_proj_b"]
        # in_proj(q(x)) == x @ (Wi_q @ Wq)^T + bi_q ; attention scale folded into Q
        wq_blk = (wi[:c2] @ layer["wq"]) * scale
        wk_blk = wi[c2:2 * c2] @ layer["wk"]
        wv_blk = wi[2 * c2:] @ layer["wv"]
        w_qkv = jnp.concatenate([wq_blk, wk_blk, wv_blk], axis=0)      # (3c2, c2)
        b_qkv = jnp.concatenate([bi[:c2] * scale, bi[c2:]], axis=0)    # (3c2,)
        # fc2(fc1(x)) has no nonlinearity in between -> single weight (exact)
        w_ffn = layer["w_fc2"] @ layer["w_fc1"]
        layers.append({
            "wt_qkv": w_qkv.T.astype(COMPUTE_DTYPE),
            "b_qkv": b_qkv.reshape(1, 3 * c2).astype(jnp.float32),
            "wt_out": layer["out_w"].T.astype(COMPUTE_DTYPE),
            "b_out": layer["out_b"].reshape(1, c2).astype(jnp.float32),
            "wt_ffn": w_ffn.T.astype(COMPUTE_DTYPE),
        })
    folded["layers"] = layers
    return folded


# ---------------------------------------------------------------------------
# Forward pass (mirrors TransformerBlock.forward)
# ---------------------------------------------------------------------------
def transformer_block_forward(x, folded, num_heads):
    B, C1, H, W = x.shape
    c2 = folded["c2"]
    S = H * W
    out_dtype = x.dtype

    # Batch-major row layout (row = b*S + s): numerically identical to torch's
    # seq-major flatten/permute (every op is per-row or per-batch).  The only
    # host transpose is on the (small) conv input; the conv kernel emits
    # row-major (B*S, c2) directly.
    xb = x.astype(COMPUTE_DTYPE)
    if "conv" in folded:
        rows = xb.reshape(B, C1, S).transpose(0, 2, 1).reshape(B * S, C1)
        rows = pallas_conv_bn_silu(rows, folded["conv"]["wbd"],
                                   folded["conv"]["scale"], folded["conv"]["shift"])
    else:
        rows = xb.reshape(B, c2, S).transpose(0, 2, 1).reshape(B * S, c2)

    # p + self.linear(p)
    p2 = pallas_linear(rows, folded["lin_wt"], bias=folded["lin_b"], residual=rows)

    for layer in folded["layers"]:
        # fused q/k/v + in-projection: one (B*S, c2) x (c2, 3c2) matmul
        qkv = pallas_linear(p2, layer["wt_qkv"], bias=layer["b_qkv"])
        # attention + out-projection + residual, fused per batch element
        p2 = pallas_mha_outproj(qkv, p2, layer["wt_out"], layer["b_out"],
                                B, S, c2, num_heads)
        # x = fc2(fc1(x)) + x  (weights pre-multiplied at fold time)
        p2 = pallas_linear(p2, layer["wt_ffn"], residual=p2)

    # back to (B, c2, H, W), original dtype
    out = p2.reshape(B, S, c2).transpose(0, 2, 1).reshape(B, c2, H, W)
    return out.astype(out_dtype)


if __name__ == "__main__":
    key = jax.random.PRNGKey(0)
    k_x, k_p = jax.random.split(key)

    B, C1, H, W = 2, 4, 16, 16
    C2, NUM_HEADS, NUM_LAYERS = 32, 4, 2

    x = jax.random.normal(k_x, (B, C1, H, W), jnp.float32)
    params = init_params(k_p, C1, C2, NUM_HEADS, NUM_LAYERS)
    folded = fold_params(params, NUM_HEADS)

    y = transformer_block_forward(x, folded, NUM_HEADS)
    y = jax.block_until_ready(y)
    assert y.shape == (B, C2, H, W), y.shape
    assert bool(jnp.all(jnp.isfinite(y)))
    print("KERNEL_OK")
</pallas_src>

<mosaic_0001>
module attributes {stable_mosaic.version = 11 : i64} {
  func.func @_conv_bn_silu_kernel(%arg0: i32, %arg1: memref<256x4xbf16, #tpu.memory_space<vmem>>, %arg2: memref<4x32xbf16, #tpu.memory_space<vmem>>, %arg3: memref<1x32xf32, #tpu.memory_space<vmem>>, %arg4: memref<1x32xf32, #tpu.memory_space<vmem>>, %arg5: memref<256x32xbf16, #tpu.memory_space<vmem>>) attributes {dimension_semantics = [#tpu.dimension_semantics<parallel>], iteration_bounds = array<i64: 2>, scalar_prefetch = 0 : i64, scratch_operands = 0 : i64, tpu.core_type = #tpu.core_type<tc>, window_params = [{transform_indices = @transform_0, window_bounds = array<i64: 256, 4>}, {pipeline_mode = #tpu.pipeline_mode<synchronous>, transform_indices = @transform_1, window_bounds = array<i64: 4, 32>}, {pipeline_mode = #tpu.pipeline_mode<synchronous>, transform_indices = @transform_2, window_bounds = array<i64: 1, 32>}, {pipeline_mode = #tpu.pipeline_mode<synchronous>, transform_indices = @transform_3, window_bounds = array<i64: 1, 32>}, {transform_indices = @transform_4, window_bounds = array<i64: 256, 32>}]} {
    %c0 = arith.constant 0 : index
    %c0_0 = arith.constant 0 : index
    %0 = vector.load %arg1[%c0, %c0_0] : memref<256x4xbf16, #tpu.memory_space<vmem>>, vector<256x4xbf16>
    %c0_1 = arith.constant 0 : index
    %c0_2 = arith.constant 0 : index
    %1 = vector.load %arg2[%c0_1, %c0_2] : memref<4x32xbf16, #tpu.memory_space<vmem>>, vector<4x32xbf16>
    %cst = arith.constant dense<0.000000e+00> : vector<256x32xf32>
    %2 = tpu.matmul %0, %1, %cst {dimension_numbers = #tpu.dot_dimension_numbers<[1], [0], [0], [1], [0, 0, 1, 1], [], []>} : vector<256x4xbf16>, vector<4x32xbf16>, vector<256x32xf32> -> vector<256x32xf32>
    %c0_3 = arith.constant 0 : index
    %c0_4 = arith.constant 0 : index
    %3 = vector.load %arg3[%c0_3, %c0_4] : memref<1x32xf32, #tpu.memory_space<vmem>>, vector<1x32xf32>
    %4 = vector.broadcast %3 : vector<1x32xf32> to vector<256x32xf32>
    %5 = arith.mulf %2, %4 : vector<256x32xf32>
    %c0_5 = arith.constant 0 : index
    %c0_6 = arith.constant 0 : index
    %6 = vector.load %arg4[%c0_5, %c0_6] : memref<1x32xf32, #tpu.memory_space<vmem>>, vector<1x32xf32>
    %7 = vector.broadcast %6 : vector<1x32xf32> to vector<256x32xf32>
    %8 = arith.addf %5, %7 : vector<256x32xf32>
    %9 = arith.negf %8 : vector<256x32xf32>
    %10 = math.exp %9 : vector<256x32xf32>
    %cst_7 = arith.constant 1.000000e+00 : f32
    %11 = vector.broadcast %cst_7 : f32 to vector<256x32xf32>
    %12 = arith.addf %11, %10 : vector<256x32xf32>
    %13 = arith.divf %11, %12 : vector<256x32xf32>
    %14 = arith.mulf %8, %13 : vector<256x32xf32>
    %15 = arith.truncf %14 : vector<256x32xf32> to vector<256x32xbf16>
    %c0_8 = arith.constant 0 : index
    %c0_9 = arith.constant 0 : index
    %16 = vector.load %arg5[%c0_8, %c0_9] : memref<256x32xbf16, #tpu.memory_space<vmem>>, vector<256x32xbf16>
    tpu.vector_store %arg5[%c0_8, %c0_9], %15 {strides = array<i32>} : memref<256x32xbf16, #tpu.memory_space<vmem>>, vector<256x32xbf16>,
    return
  }
  func.func @transform_0(%arg0: i32) -> (i32, i32) {
    %c0_i32 = arith.constant 0 : i32
    %c0_i32_0 = arith.constant 0 : i32
    return %arg0, %c0_i32 : i32, i32
  }
  func.func @transform_1(%arg0: i32) -> (i32, i32) {
    %c0_i32 = arith.constant 0 : i32
    %c0_i32_0 = arith.constant 0 : i32
    %c0_i32_1 = arith.constant 0 : i32
    return %c0_i32, %c0_i32_0 : i32, i32
  }
  func.func @transform_2(%arg0: i32) -> (i32, i32) {
    %c0_i32 = arith.constant 0 : i32
    %c0_i32_0 = arith.constant 0 : i32
    %c0_i32_1 = arith.constant 0 : i32
    return %c0_i32, %c0_i32_0 : i32, i32
  }
  func.func @transform_3(%arg0: i32) -> (i32, i32) {
    %c0_i32 = arith.constant 0 : i32
    %c0_i32_0 = arith.constant 0 : i32
    %c0_i32_1 = arith.constant 0 : i32
    return %c0_i32, %c0_i32_0 : i32, i32
  }
  func.func @transform_4(%arg0: i32) -> (i32, i32) {
    %c0_i32 = arith.constant 0 : i32
    %c0_i32_0 = arith.constant 0 : i32
    return %arg0, %c0_i32 : i32, i32
  }
}

</mosaic_0001>

<bundles_post_ra>
// kernel: tpu_custom_call.1
= control target key start
LH: loop header
LB: loop body
LE: loop exit
PB: predicated region body
PF: predicated region fallthrough
CT: control target
= control target key end

     0   :  { %s1429_s15 = smov 0   ;;  %s1785_s0 = inlined_call_operand.vmem [shape: bf16[512,4], index: 0, kind: input, shape index: {}]   ;;  %s1786_s1 = inlined_call_operand.vmem [shape: bf16[4,32], index: 1, kind: input, shape index: {}]   ;;  %s1787_s2 = inlined_call_operand.vmem [shape: f32[1,32], index: 2, kind: input, shape index: {}]   ;;  %s1788_s3 = inlined_call_operand.vmem [shape: f32[1,32], index: 3, kind: input, shape index: {}]   ;;  %s1789_s4 = inlined_call_operand.vmem [shape: bf16[512,32], index: 4, kind: output, shape index: {}]  }
   0x1 LB: > { %s1048_s16 = sadd.s32 4294967295, %s1402_s15   ;;  %p1052_p0 = scmp.ge.s32.totalorder %s1402_s15, 1  ;;  %s1402_s15 = sphi %s1429_s15, %s14_s15  }
   0x2   : > { %p163_p1 = scmp.lt.s32.totalorder %s1402_s15, 3 }
   0x4   : > { %p164_p2 = pnand %p1052_p0, %p163_p1 }
   0x5   : > { %v234_v0 = vld [vmem:[%s1786_s1] sm:$0x3] (!%p164_p2)  ;;  %vm364_vm0 = vcmask (!%p164_p2), 1041408   ;;  %s1053_s19 = sshll.u32 (!%p164_p2), %s1048_s16, 5  ;;  %vm315_vm1 = vcmask (!%p164_p2), 31744   ;;  %vm959_vm2 = vcmask (!%p164_p2), 257024  }
   0x6   : > { %167 = sbr.rel (%p164_p2) target bundleno = 324 (0x144), region = 36  ;;  %1242 = vmatprep.subr.msk.bf16.mxu0 (!%p164_p2), %vm364_vm0, %v234_v0  ;;  %1243 = vmatprep.subr.msk.bf16.mxu1 (!%p164_p2), %vm364_vm0, %v234_v0  ;;  %v366_v1 = vsel (!%p164_p2), %vm364_vm0, %v234_v0, 0  ;;  %p190_p3 = scmp.lt.s32.totalorder (!%p164_p2), %s1053_s19, 63  ;;  %v1485_v18 = vld [vmem:[%s1787_s2] ss:$0 sm:$0xff] (!%p164_p2) }
   0x7   : > { %1207 = vmatpush3.bf16.msra.mxu0 (!%p164_p2), %v366_v1  ;;  %1241 = vmatpush3.bf16.msra.mxu1 (!%p164_p2), %v366_v1  ;;  %v1490_v20 = vld [vmem:[%s1788_s3] ss:$0 sm:$0xff] (!%p164_p2) }
   0xd   : > { %s1791_s19 = smov (!%p190_p3, %s1053_s19), 63 }
   0xe   : > { %s1054_s20 = sshll.u32 %s1791_s19, 2 }
   0xf   : > { %s1448_s23 = scalar_lea.vmem %s1785_s0, %s1054_s20  ;;  %s1629_s30 = scalar_lea.vmem %s1789_s4, %s1054_s20 }
  0x10   : > { %v1252_v2 = vld [vmem:[%s1448_s23] sm:$0xff]   ;;  %v1254_v4 = vld [vmem:[%s1448_s23 + $0x8] sm:$0xff]   ;;  %v1256_v6 = vld [vmem:[%s1448_s23 + $0x10] sm:$0xff]  }
  0x11   : > { %v1253_v3 = vld [vmem:[%s1448_s23 + $0x40] sm:$0xff]   ;;  %1208 = vmatprep.mubr.msk.bf16.mxu0 %vm315_vm1, %v1252_v2  ;;  %v1255_v5 = vld [vmem:[%s1448_s23 + $0x48] sm:$0xff]   ;;  %v1257_v7 = vld [vmem:[%s1448_s23 + $0x50] sm:$0xff]  }
  0x12   : > { %1224 = vmatprep.mubr.msk.bf16.mxu1 %vm315_vm1, %v1253_v3  ;;  %1209 = vmatmul.mubr.msk.bf16.vlgmr.msra.gmra.mrb[0].mxu0 %vm315_vm1, %v1254_v4  ;;  %v1258_v8 = vld [vmem:[%s1448_s23 + $0x18] sm:$0xff]   ;;  %v1260_v10 = vld [vmem:[%s1448_s23 + $0x20] sm:$0xff]   ;;  %v1262_v12 = vld [vmem:[%s1448_s23 + $0x28] sm:$0xff]  }
  0x13   : > { %1225 = vmatmul.mubr.msk.bf16.vlgmr.msra.gmra.mrb[0].mxu1 %vm315_vm1, %v1255_v5  ;;  %1212 = vmatprep.mubr.msk.bf16.mxu0 %vm315_vm1, %v1256_v6  ;;  %v1259_v9 = vld [vmem:[%s1448_s23 + $0x58] sm:$0xff]   ;;  %v1261_v11 = vld [vmem:[%s1448_s23 + $0x60] sm:$0xff]   ;;  %v1263_v13 = vld [vmem:[%s1448_s23 + $0x68] sm:$0xff]  }
  0x14   : > { %1228 = vmatprep.mubr.msk.bf16.mxu1 %vm315_vm1, %v1257_v7  ;;  %v1264_v14 = vld [vmem:[%s1448_s23 + $0x30] sm:$0xff]   ;;  %v1266_v16 = vld [vmem:[%s1448_s23 + $0x38] sm:$0xff]  }
  0x15   : > { %v1265_v15 = vld [vmem:[%s1448_s23 + $0x70] sm:$0xff]   ;;  %v1267_v17 = vld [vmem:[%s1448_s23 + $0x78] sm:$0xff]  }
  0x1a   : > { %1213 = vmatmul.mubr.msk.bf16.gmra.mrb[4].mxu0 %vm315_vm1, %v1258_v8 }
  0x1b   : > { %1229 = vmatmul.mubr.msk.bf16.gmra.mrb[4].mxu1 %vm315_vm1, %v1259_v9  ;;  %1216 = vmatprep.mubr.msk.bf16.mxu0 %vm315_vm1, %v1260_v10 }
  0x1c   : > { %1232 = vmatprep.mubr.msk.bf16.mxu1 %vm315_vm1, %v1261_v11 }
  0x22   : > { %1217 = vmatmul.mubr.msk.bf16.gmra.mrb[8].mxu0 %vm315_vm1, %v1262_v12 }
  0x23   : > { %1233 = vmatmul.mubr.msk.bf16.gmra.mrb[8].mxu1 %vm315_vm1, %v1263_v13  ;;  %1220 = vmatprep.mubr.msk.bf16.mxu0 %vm315_vm1, %v1264_v14 }
  0x24   : > { %1236 = vmatprep.mubr.msk.bf16.mxu1 %vm315_vm1, %v1265_v15 }
  0x2a   : > { %1221 = vmatmul.mubr.msk.bf16.gmra.mrb[12].mxu0 %vm315_vm1, %v1266_v16 }
  0x2b   : > { %1237 = vmatmul.mubr.msk.bf16.gmra.mrb[12].mxu1 %vm315_vm1, %v1267_v17 }
  0xe5   : > { %v1210_v19 = vpop.f32.mrb[0].mxu0 }
  0xe6   : > { %v538_v21 = vmul.f32 %v1210_v19, %v1485_v18  ;;  %v1226_v22 = vpop.f32.mrb[0].mxu1  ;;  %v402_v23 = vpop.f32.mrb[1].mxu0 }
  0xe7   : > { %v554_v24 = vmul.f32 %v1226_v22, %v1485_v18  ;;  %v536_v25 = vmul.f32 %v1485_v18, %v402_v23  ;;  %v466_v26 = vpop.f32.mrb[1].mxu1  ;;  %v1211_v27 = vpop.f32.mrb[2].mxu0 }
  0xe8   : > { %v1496_v28 = vadd.f32 %v1490_v20, %v538_v21  ;;  %v552_v29 = vmul.f32 %v1485_v18, %v466_v26  ;;  %v539_v30 = vmul.f32 %v1211_v27, %v1485_v18  ;;  %v1227_v31 = vpop.f32.mrb[2].mxu1  ;;  %v405_v32 = vpop.f32.mrb[3].mxu0 }
  0xe9   : > { %v1501_v33 = vadd.f32 %v1490_v20, %v554_v24  ;;  %v1504_v34 = vadd.f32 %v1490_v20, %v536_v25  ;;  %v555_v35 = vmul.f32 %v1227_v31, %v1485_v18  ;;  %v537_v36 = vmul.f32 %v1485_v18, %v405_v32  ;;  %v469_v37 = vpop.f32.mrb[3].mxu1 }
  0xea   : > { %v1093_v38 = vmul.f32 -1.442695, %v1496_v28  ;;  %v1510_v39 = vadd.f32 %v1490_v20, %v552_v29  ;;  %v1513_v40 = vadd.f32 %v1490_v20, %v539_v30  ;;  %v553_v41 = vmul.f32 %v1485_v18, %v469_v37 }
  0xeb   : > { %v1109_v42 = vmul.f32 -1.442695, %v1501_v33  ;;  %v1091_v43 = vmul.f32 -1.442695, %v1504_v34  ;;  %v1519_v44 = vadd.f32 %v1490_v20, %v555_v35  ;;  %v1522_v45 = vadd.f32 %v1490_v20, %v537_v36 }
  0xec   : > { %1268 = vpow2.f32 %v1093_v38  ;;  %v1107_v46 = vmul.f32 -1.442695, %v1510_v39  ;;  %v1094_v47 = vmul.f32 -1.442695, %v1513_v40  ;;  %v1527_v48 = vadd.f32 %v1490_v20, %v553_v41 }
  0xed   : > { %1270 = vpow2.f32 %v1109_v42  ;;  %v1110_v49 = vmul.f32 -1.442695, %v1519_v44  ;;  %v1214_v50 = vpop.f32.mrb[4].mxu0  ;;  %v1092_v51 = vmul.f32 -1.442695, %v1522_v45 }
  0xee   : > { %1272 = vpow2.f32 %v1091_v43  ;;  %v542_v52 = vmul.f32 %v1214_v50, %v1485_v18  ;;  %v1230_v53 = vpop.f32.mrb[4].mxu1  ;;  %v418_v54 = vpop.f32.mrb[5].mxu0  ;;  %v1108_v55 = vmul.f32 -1.442695, %v1527_v48 }
  0xef   : > { %1274 = vpow2.f32 %v1107_v46  ;;  %v558_v56 = vmul.f32 %v1230_v53, %v1485_v18  ;;  %v540_v57 = vmul.f32 %v1485_v18, %v418_v54  ;;  %v482_v58 = vpop.f32.mrb[5].mxu1  ;;  %v1215_v59 = vpop.f32.mrb[6].mxu0 }
  0xf0   : > { %1276 = vpow2.f32 %v1094_v47  ;;  %v1536_v60 = vadd.f32 %v1490_v20, %v542_v52  ;;  %v556_v61 = vmul.f32 %v1485_v18, %v482_v58  ;;  %v543_v62 = vmul.f32 %v1215_v59, %v1485_v18  ;;  %v1231_v63 = vpop.f32.mrb[6].mxu1  ;;  %v421_v0 = vpop.f32.mrb[7].mxu0 }
  0xf1   : > { %1278 = vpow2.f32 %v1110_v49  ;;  %v1541_v1 = vadd.f32 %v1490_v20, %v558_v56  ;;  %v1544_v2 = vadd.f32 %v1490_v20, %v540_v57  ;;  %v559_v3 = vmul.f32 %v1231_v63, %v1485_v18  ;;  %v485_v4 = vpop.f32.mrb[7].mxu1 }
  0xf2   : > { %1280 = vpow2.f32 %v1092_v51  ;;  %v1097_v5 = vmul.f32 -1.442695, %v1536_v60  ;;  %v1549_v6 = vadd.f32 %v1490_v20, %v556_v61  ;;  %v1552_v7 = vadd.f32 %v1490_v20, %v543_v62 }
  0xf3   : > { %1282 = vpow2.f32 %v1108_v55  ;;  %v1113_v8 = vmul.f32 -1.442695, %v1541_v1  ;;  %v1095_v9 = vmul.f32 -1.442695, %v1544_v2  ;;  %v1559_v12 = vadd.f32 %v1490_v20, %v559_v3 }
  0xf4   : > { %1284 = vpow2.f32 %v1097_v5  ;;  %v1111_v10 = vmul.f32 -1.442695, %v1549_v6  ;;  %v1098_v11 = vmul.f32 -1.442695, %v1552_v7  ;;  %v541_v21 = vmul.f32 %v1485_v18, %v421_v0 }
  0xf5   : > { %1286 = vpow2.f32 %v1113_v8  ;;  %v1218_v13 = vpop.f32.mrb[8].mxu0  ;;  %v557_v26 = vmul.f32 %v1485_v18, %v485_v4  ;;  %v1566_v32 = vmul.f32 -1.442695, %v1559_v12 }
  0xf6   : > { %v1269_v14 = vpop.eup %1268  ;;  %1288 = vpow2.f32 %v1095_v9  ;;  %v1234_v15 = vpop.f32.mrb[8].mxu1  ;;  %v546_v35 = vmul.f32 %v1218_v13, %v1485_v18  ;;  %v1574_v47 = vadd.f32 %v1490_v20, %v541_v21 }
  0xf7   : > { %v434_v16 = vpop.f32.mrb[9].mxu0  ;;  %v1271_v17 = vpop.eup %1270  ;;  %v705_v19 = vadd.f32 1.0, %v1269_v14  ;;  %1290 = vpow2.f32 %v1111_v10  ;;  %v562_v41 = vmul.f32 %v1234_v15, %v1485_v18  ;;  %v1578_v52 = vadd.f32 %v1490_v20, %v557_v26 }
  0xf8   : > { %v498_v22 = vpop.f32.mrb[9].mxu1  ;;  %v1219_v23 = vpop.f32.mrb[10].mxu0  ;;  %v721_v25 = vadd.f32 1.0, %v1271_v17  ;;  %1292 = vpow2.f32 %v1098_v11  ;;  %v544_v42 = vmul.f32 %v1485_v18, %v434_v16  ;;  %v1582_v56 = vadd.f32 %v1490_v20, %v546_v35 }
  0xf9   : > { %v1273_v24 = vpop.eup %1272  ;;  %v1235_v27 = vpop.f32.mrb[10].mxu1  ;;  %1294 = vrcp.f32 %v705_v19  ;;  %v560_v49 = vmul.f32 %v1485_v18, %v498_v22  ;;  %v547_v53 = vmul.f32 %v1219_v23, %v1485_v18  ;;  %v1586_v62 = vadd.f32 %v1490_v20, %v562_v41 }
  0xfa   : > { %v1563_v29 = vpop.f32.mrb[11].mxu0  ;;  %v1275_v30 = vpop.eup %1274  ;;  %v703_v31 = vadd.f32 1.0, %v1273_v24  ;;  %1296 = vrcp.f32 %v721_v25  ;;  %v563_v57 = vmul.f32 %v1235_v27, %v1485_v18  ;;  %v1589_v63 = vadd.f32 %v1490_v20, %v544_v42 }
  0xfb   : > { %v1569_v36 = vpop.f32.mrb[11].mxu1  ;;  %v1277_v37 = vpop.eup %1276  ;;  %v719_v38 = vadd.f32 1.0, %v1275_v30  ;;  %v1096_v8 = vmul.f32 -1.442695, %v1574_v47  ;;  %v1595_v9 = vadd.f32 %v1490_v20, %v560_v49  ;;  %v1112_v15 = vmul.f32 -1.442695, %v1578_v52 }
  0xfc   : > { %v1279_v43 = vpop.eup %1278  ;;  %1298 = vrcp.f32 %v703_v31  ;;  %v706_v46 = vadd.f32 1.0, %v1277_v37  ;;  %v1603_v16 = vadd.f32 %v1490_v20, %v547_v53  ;;  %v1101_v23 = vmul.f32 -1.442695, %v1582_v56 }
  0xfd   : > { %v1281_v50 = vpop.eup %1280  ;;  %1300 = vrcp.f32 %v719_v38  ;;  %v722_v51 = vadd.f32 1.0, %v1279_v43  ;;  %v1222_v58 = vpop.f32.mrb[12].mxu0  ;;  %v1611_v24 = vadd.f32 %v1490_v20, %v563_v57  ;;  %v1117_v30 = vmul.f32 -1.442695, %v1586_v62 }
  0xfe   : > { %v1283_v54 = vpop.eup %1282  ;;  %1302 = vrcp.f32 %v706_v46  ;;  %v704_v55 = vadd.f32 1.0, %v1281_v50  ;;  %v1238_v0 = vpop.f32.mrb[12].mxu1  ;;  %v1099_v31 = vmul.f32 -1.442695, %v1589_v63  ;;  %v1115_v38 = vmul.f32 -1.442695, %v1595_v9 }
  0xff   : > { %v1285_v59 = vpop.eup %1284  ;;  %1304 = vrcp.f32 %v722_v51  ;;  %v720_v61 = vadd.f32 1.0, %v1283_v54  ;;  %v1591_v3 = vpop.f32.mrb[13].mxu0  ;;  %v545_v41 = vmul.f32 %v1485_v18, %v1563_v29  ;;  %v1102_v46 = vmul.f32 -1.442695, %v1603_v16 }
 0x100   : > { %v1287_v4 = vpop.eup %1286  ;;  %1306 = vrcp.f32 %v704_v55  ;;  %v709_v5 = vadd.f32 1.0, %v1285_v59  ;;  %v1597_v10 = vpop.f32.mrb[13].mxu1  ;;  %v561_v49 = vmul.f32 %v1485_v18, %v1569_v36  ;;  %v1118_v29 = vmul.f32 -1.442695, %v1611_v24 }
 0x101   : > { %v1599_v11 = vpop.f32.mrb[14].mxu0  ;;  %v1289_v13 = vpop.eup %1288  ;;  %1308 = vrcp.f32 %v720_v61  ;;  %v725_v14 = vadd.f32 1.0, %v1287_v4  ;;  %v566_v55 = vmul.f32 %v1238_v0, %v1485_v18 }
 0x102   : > { %v1605_v17 = vpop.f32.mrb[14].mxu1  ;;  %v1607_v19 = vpop.f32.mrb[15].mxu0  ;;  %1310 = vrcp.f32 %v709_v5  ;;  %v707_v22 = vadd.f32 1.0, %v1289_v13 }
 0x103   : > { %v1291_v21 = vpop.eup %1290  ;;  %v1613_v25 = vpop.f32.mrb[15].mxu1  ;;  %1312 = vrcp.f32 %v725_v14 }
 0x104   : > { %v1293_v26 = vpop.eup %1292  ;;  %v723_v27 = vadd.f32 1.0, %v1291_v21  ;;  %1314 = vrcp.f32 %v707_v22 }
 0x105   : > { %v1295_v35 = vpop.eup %1294  ;;  %v710_v37 = vadd.f32 1.0, %v1293_v26 }
 0x106   : > { %v1297_v42 = vpop.eup %1296  ;;  %v801_v43 = vmul.f32 %v1295_v35, %v1496_v28  ;;  %1316 = vrcp.f32 %v723_v27  ;;  %v550_v28 = vmul.f32 %v1222_v58, %v1485_v18 }
 0x107   : > { %v1299_v50 = vpop.eup %1298  ;;  %v817_v51 = vmul.f32 %v1297_v42, %v1501_v33  ;;  %1318 = vrcp.f32 %v710_v37  ;;  %v1639_v33 = vadd.f32 %v1490_v20, %v545_v41 }
 0x108   : > { %v1301_v53 = vpop.eup %1300  ;;  %v1159_v54 = vpack.c.bf16 %v801_v43, %v801_v43  ;;  %v799_v36 = vmul.f32 %v1299_v50, %v1504_v34  ;;  %1320 = vpow2.f32 %v1566_v32  ;;  %v1645_v34 = vadd.f32 %v1490_v20, %v561_v49 }
 0x109   : > { %v1303_v57 = vpop.eup %1302  ;;  %v1175_v59 = vpack.c.bf16 %v817_v51, %v817_v51  ;;  %v815_v61 = vmul.f32 %v1301_v53, %v1510_v39  ;;  %1322 = vpow2.f32 %v1096_v8  ;;  %v1651_v8 = vadd.f32 %v1490_v20, %v550_v28 }
 0x10a   : > { %v1305_v4 = vpop.eup %1304  ;;  %962 = vst.msk [vmem:[%s1629_s30 + $0x8] sm:$0xf] %vm959_vm2, %v1159_v54  ;;  %v1157_v58 = vpack.c.bf16 %v799_v36, %v799_v36  ;;  %v802_v5 = vmul.f32 %v1303_v57, %v1513_v40  ;;  %1324 = vpow2.f32 %v1112_v15  ;;  %v1657_v15 = vadd.f32 %v1490_v20, %v566_v55 }
 0x10b   : > { %v1307_v32 = vpop.eup %1306  ;;  %978 = vst.msk [vmem:[%s1629_s30 + $0x48] sm:$0xf] %vm959_vm2, %v1175_v59  ;;  %v1173_v39 = vpack.c.bf16 %v815_v61, %v815_v61  ;;  %v818_v0 = vmul.f32 %v1305_v4, %v1519_v44  ;;  %1326 = vpow2.f32 %v1101_v23  ;;  %v1100_v23 = vmul.f32 -1.442695, %v1639_v33 }
 0x10c   : > { %v1309_v13 = vpop.eup %1308  ;;  %960 = vst.msk [vmem:[%s1629_s30] sm:$0xf] %vm959_vm2, %v1157_v58  ;;  %v1160_v40 = vpack.c.bf16 %v802_v5, %v802_v5  ;;  %v800_v14 = vmul.f32 %v1307_v32, %v1522_v45  ;;  %1328 = vpow2.f32 %v1117_v30  ;;  %v1116_v30 = vmul.f32 -1.442695, %v1645_v34 }
 0x10d   : > { %v1311_v21 = vpop.eup %1310  ;;  %976 = vst.msk [vmem:[%s1629_s30 + $0x40] sm:$0xf] %vm959_vm2, %v1173_v39  ;;  %v1176_v44 = vpack.c.bf16 %v818_v0, %v818_v0  ;;  %v816_v22 = vmul.f32 %v1309_v13, %v1527_v48  ;;  %1330 = vpow2.f32 %v1099_v31  ;;  %v1105_v31 = vmul.f32 -1.442695, %v1651_v8 }
 0x10e   : > { %v1313_v26 = vpop.eup %1312  ;;  %963 = vst.msk [vmem:[%s1629_s30 + $0xc] sm:$0xf] %vm959_vm2, %v1160_v40  ;;  %v1158_v27 = vpack.c.bf16 %v800_v14, %v800_v14  ;;  %v805_v45 = vmul.f32 %v1311_v21, %v1536_v60  ;;  %1332 = vpow2.f32 %v1115_v38  ;;  %v1121_v38 = vmul.f32 -1.442695, %v1657_v15 }
 0x10f   : > { %v1315_v35 = vpop.eup %1314  ;;  %979 = vst.msk [vmem:[%s1629_s30 + $0x4c] sm:$0xf] %vm959_vm2, %v1176_v44  ;;  %v1174_v37 = vpack.c.bf16 %v816_v22, %v816_v22  ;;  %v821_v48 = vmul.f32 %v1313_v26, %v1541_v1  ;;  %1334 = vpow2.f32 %v1102_v46  ;;  %v548_v59 = vmul.f32 %v1485_v18, %v1591_v3 }
 0x110   : > { %v1317_v41 = vpop.eup %1316  ;;  %961 = vst.msk [vmem:[%s1629_s30 + $0x4] sm:$0xf] %vm959_vm2, %v1158_v27  ;;  %v1163_v42 = vpack.c.bf16 %v805_v45, %v805_v45  ;;  %v803_v60 = vmul.f32 %v1315_v35, %v1544_v2  ;;  %1336 = vpow2.f32 %v1118_v29  ;;  %v564_v58 = vmul.f32 %v1485_v18, %v1597_v10 }
 0x111   : > { %v1319_v43 = vpop.eup %1318  ;;  %977 = vst.msk [vmem:[%s1629_s30 + $0x44] sm:$0xf] %vm959_vm2, %v1174_v37  ;;  %v1179_v49 = vpack.c.bf16 %v821_v48, %v821_v48  ;;  %v819_v1 = vmul.f32 %v1317_v41, %v1549_v6  ;;  %1338 = vpow2.f32 %v1100_v23  ;;  %v551_v39 = vmul.f32 %v1599_v11, %v1485_v18 }
 0x112   : > { %v1321_v46 = vpop.eup %1320  ;;  %966 = vst.msk [vmem:[%s1629_s30 + $0x18] sm:$0xf] %vm959_vm2, %v1163_v42  ;;  %v1161_v50 = vpack.c.bf16 %v803_v60, %v803_v60  ;;  %v806_v51 = vmul.f32 %v1319_v43, %v1552_v7  ;;  %1340 = vpow2.f32 %v1116_v30  ;;  %v567_v40 = vmul.f32 %v1605_v17, %v1485_v18 }
 0x113   : > { %v1323_v2 = vpop.eup %1322  ;;  %982 = vst.msk [vmem:[%s1629_s30 + $0x58] sm:$0xf] %vm959_vm2, %v1179_v49  ;;  %v1177_v29 = vpack.c.bf16 %v819_v1, %v819_v1  ;;  %v726_v28 = vadd.f32 1.0, %v1321_v46  ;;  %1342 = vpow2.f32 %v1105_v31  ;;  %v1698_v21 = vadd.f32 %v1490_v20, %v548_v59 }
 0x114   : > { %v1325_v53 = vpop.eup %1324  ;;  %964 = vst.msk [vmem:[%s1629_s30 + $0x10] sm:$0xf] %vm959_vm2, %v1161_v50  ;;  %v1164_v6 = vpack.c.bf16 %v806_v51, %v806_v51  ;;  %v708_v54 = vadd.f32 1.0, %v1323_v2  ;;  %1344 = vpow2.f32 %v1121_v38  ;;  %v549_v10 = vmul.f32 %v1485_v18, %v1607_v19 }
 0x115   : > { %v1327_v36 = vpop.eup %1326  ;;  %980 = vst.msk [vmem:[%s1629_s30 + $0x50] sm:$0xf] %vm959_vm2, %v1177_v29  ;;  %1346 = vrcp.f32 %v726_v28  ;;  %v724_v55 = vadd.f32 1.0, %v1325_v53  ;;  %v1703_v11 = vadd.f32 %v1490_v20, %v564_v58  ;;  %v565_v23 = vmul.f32 %v1485_v18, %v1613_v25 }
 0x116   : > { %v1329_v7 = vpop.eup %1328  ;;  %967 = vst.msk [vmem:[%s1629_s30 + $0x1c] sm:$0xf] %vm959_vm2, %v1164_v6  ;;  %1348 = vrcp.f32 %v708_v54  ;;  %v713_v57 = vadd.f32 1.0, %v1327_v36  ;;  %v1708_v27 = vadd.f32 %v1490_v20, %v551_v39  ;;  %v1711_v19 = vadd.f32 %v1490_v20, %v567_v40 }
 0x117   : > { %v1331_v61 = vpop.eup %1330  ;;  %1350 = vrcp.f32 %v724_v55  ;;  %v729_v4 = vadd.f32 1.0, %v1329_v7  ;;  %v1103_v48 = vmul.f32 -1.442695, %v1698_v21  ;;  %v1715_v31 = vadd.f32 %v1490_v20, %v549_v10 }
 0x118   : > { %v1333_v5 = vpop.eup %1332  ;;  %1352 = vrcp.f32 %v713_v57  ;;  %v711_v32 = vadd.f32 1.0, %v1331_v61  ;;  %v1119_v41 = vmul.f32 -1.442695, %v1703_v11  ;;  %v1719_v42 = vadd.f32 %v1490_v20, %v565_v23 }
 0x119   : > { %v1335_v0 = vpop.eup %1334  ;;  %1354 = vrcp.f32 %v729_v4  ;;  %v727_v13 = vadd.f32 1.0, %v1333_v5  ;;  %v1106_v43 = vmul.f32 -1.442695, %v1708_v27  ;;  %v1122_v46 = vmul.f32 -1.442695, %v1711_v19 }
 0x11a   : > { %v1337_v14 = vpop.eup %1336  ;;  %1356 = vrcp.f32 %v711_v32  ;;  %v714_v3 = vadd.f32 1.0, %v1335_v0  ;;  %v1104_v20 = vmul.f32 -1.442695, %v1715_v31  ;;  %v1120_v53 = vmul.f32 -1.442695, %v1719_v42 }
 0x11b   : > { %v1339_v44 = vpop.eup %1338  ;;  %1358 = vrcp.f32 %v727_v13  ;;  %v730_v22 = vadd.f32 1.0, %v1337_v14 }
 0x11c   : > { %v1341_v26 = vpop.eup %1340  ;;  %1360 = vrcp.f32 %v714_v3  ;;  %v712_v17 = vadd.f32 1.0, %v1339_v44 }
 0x11d   : > { %v1343_v45 = vpop.eup %1342  ;;  %1362 = vrcp.f32 %v730_v22  ;;  %v728_v30 = vadd.f32 1.0, %v1341_v26 }
 0x11e   : > { %v1345_v35 = vpop.eup %1344  ;;  %1364 = vrcp.f32 %v712_v17  ;;  %v717_v37 = vadd.f32 1.0, %v1343_v45 }
 0x11f   : > { %v1347_v18 = vpop.eup %1346  ;;  %1366 = vrcp.f32 %v728_v30  ;;  %v733_v25 = vadd.f32 1.0, %v1345_v35 }
 0x120   : > { %v1349_v60 = vpop.eup %1348  ;;  %v822_v38 = vmul.f32 %v1347_v18, %v1559_v12  ;;  %1368 = vrcp.f32 %v717_v37 }
 0x121   : > { %v1351_v49 = vpop.eup %1350  ;;  %v804_v1 = vmul.f32 %v1349_v60, %v1574_v47  ;;  %1370 = vrcp.f32 %v733_v25 }
 0x122   : > { %v1353_v50 = vpop.eup %1352  ;;  %v1180_v51 = vpack.c.bf16 %v822_v38, %v822_v38  ;;  %v820_v2 = vmul.f32 %v1351_v49, %v1578_v52  ;;  %1372 = vpow2.f32 %v1103_v48 }
 0x123   : > { %v1355_v29 = vpop.eup %1354  ;;  %v1162_v12 = vpack.c.bf16 %v804_v1, %v804_v1  ;;  %v809_v28 = vmul.f32 %v1353_v50, %v1582_v56  ;;  %1374 = vpow2.f32 %v1119_v41 }
 0x124   : > { %v1357_v47 = vpop.eup %1356  ;;  %983 = vst.msk [vmem:[%s1629_s30 + $0x5c] sm:$0xf] %vm959_vm2, %v1180_v51  ;;  %v1178_v6 = vpack.c.bf16 %v820_v2, %v820_v2  ;;  %v825_v54 = vmul.f32 %v1355_v29, %v1586_v62  ;;  %1376 = vpow2.f32 %v1106_v43 }
 0x125   : > { %v1359_v52 = vpop.eup %1358  ;;  %965 = vst.msk [vmem:[%s1629_s30 + $0x14] sm:$0xf] %vm959_vm2, %v1162_v12  ;;  %v1167_v36 = vpack.c.bf16 %v809_v28, %v809_v28  ;;  %v807_v55 = vmul.f32 %v1357_v47, %v1589_v63  ;;  %1378 = vpow2.f32 %v1122_v46 }
 0x126   : > { %v1361_v56 = vpop.eup %1360  ;;  %981 = vst.msk [vmem:[%s1629_s30 + $0x54] sm:$0xf] %vm959_vm2, %v1178_v6  ;;  %v1183_v7 = vpack.c.bf16 %v825_v54, %v825_v54  ;;  %v823_v57 = vmul.f32 %v1359_v52, %v1595_v9  ;;  %1380 = vpow2.f32 %v1104_v20 }
 0x127   : > { %v1363_v59 = vpop.eup %1362  ;;  %970 = vst.msk [vmem:[%s1629_s30 + $0x28] sm:$0xf] %vm959_vm2, %v1167_v36  ;;  %v1165_v62 = vpack.c.bf16 %v807_v55, %v807_v55  ;;  %v810_v61 = vmul.f32 %v1361_v56, %v1603_v16  ;;  %1382 = vpow2.f32 %v1120_v53 }
 0x128   : > { %v1365_v4 = vpop.eup %1364  ;;  %986 = vst.msk [vmem:[%s1629_s30 + $0x68] sm:$0xf] %vm959_vm2, %v1183_v7  ;;  %v1181_v63 = vpack.c.bf16 %v823_v57, %v823_v57  ;;  %v826_v58 = vmul.f32 %v1363_v59, %v1611_v24 }
 0x129   : > { %v1367_v5 = vpop.eup %1366  ;;  %968 = vst.msk [vmem:[%s1629_s30 + $0x20] sm:$0xf] %vm959_vm2, %v1165_v62  ;;  %v1168_v9 = vpack.c.bf16 %v810_v61, %v810_v61  ;;  %v808_v32 = vmul.f32 %v1365_v4, %v1639_v33 }
 0x12a   : > { %v1369_v39 = vpop.eup %1368  ;;  %984 = vst.msk [vmem:[%s1629_s30 + $0x60] sm:$0xf] %vm959_vm2, %v1181_v63  ;;  %v1184_v16 = vpack.c.bf16 %v826_v58, %v826_v58  ;;  %v824_v0 = vmul.f32 %v1367_v5, %v1645_v34 }
 0x12b   : > { %v1371_v13 = vpop.eup %1370  ;;  %971 = vst.msk [vmem:[%s1629_s30 + $0x2c] sm:$0xf] %vm959_vm2, %v1168_v9  ;;  %v1166_v40 = vpack.c.bf16 %v808_v32, %v808_v32  ;;  %v813_v24 = vmul.f32 %v1369_v39, %v1651_v8 }
 0x12c   : > { %v1373_v14 = vpop.eup %1372  ;;  %987 = vst.msk [vmem:[%s1629_s30 + $0x6c] sm:$0xf] %vm959_vm2, %v1184_v16  ;;  %v1182_v3 = vpack.c.bf16 %v824_v0, %v824_v0  ;;  %v829_v33 = vmul.f32 %v1371_v13, %v1657_v15 }
 0x12d   : > { %v1375_v10 = vpop.eup %1374  ;;  %969 = vst.msk [vmem:[%s1629_s30 + $0x24] sm:$0xf] %vm959_vm2, %v1166_v40  ;;  %v1171_v44 = vpack.c.bf16 %v813_v24, %v813_v24  ;;  %v715_v22 = vadd.f32 1.0, %v1373_v14 }
 0x12e   : > { %v1377_v34 = vpop.eup %1376  ;;  %985 = vst.msk [vmem:[%s1629_s30 + $0x64] sm:$0xf] %vm959_vm2, %v1182_v3  ;;  %v1187_v23 = vpack.c.bf16 %v829_v33, %v829_v33  ;;  %v731_v26 = vadd.f32 1.0, %v1375_v10 }
 0x12f   : > { %v1379_v17 = vpop.eup %1378  ;;  %974 = vst.msk [vmem:[%s1629_s30 + $0x38] sm:$0xf] %vm959_vm2, %v1171_v44  ;;  %1384 = vrcp.f32 %v715_v22  ;;  %v718_v8 = vadd.f32 1.0, %v1377_v34 }
 0x130   : > { %v1381_v45 = vpop.eup %1380  ;;  %990 = vst.msk [vmem:[%s1629_s30 + $0x78] sm:$0xf] %vm959_vm2, %v1187_v23  ;;  %1386 = vrcp.f32 %v731_v26  ;;  %v734_v15 = vadd.f32 1.0, %v1379_v17 }
 0x131   : > { %v1383_v30 = vpop.eup %1382  ;;  %1388 = vrcp.f32 %v718_v8  ;;  %v716_v35 = vadd.f32 1.0, %v1381_v45 }
 0x132   : > { %1390 = vrcp.f32 %v734_v15  ;;  %v732_v37 = vadd.f32 1.0, %v1383_v30 }
 0x133   : > { %1392 = vrcp.f32 %v716_v35 }
 0x134   : > { %1394 = vrcp.f32 %v732_v37 }
 0x139   : > { %v1385_v48 = vpop.eup %1384 }
 0x13a   : > { %v1387_v18 = vpop.eup %1386  ;;  %v811_v25 = vmul.f32 %v1385_v48, %v1698_v21 }
 0x13b   : > { %v1389_v41 = vpop.eup %1388  ;;  %v827_v60 = vmul.f32 %v1387_v18, %v1703_v11 }
 0x13c   : > { %v1391_v38 = vpop.eup %1390  ;;  %v1169_v43 = vpack.c.bf16 %v811_v25, %v811_v25  ;;  %v814_v49 = vmul.f32 %v1389_v41, %v1708_v27 }
 0x13d   : > { %v1393_v1 = vpop.eup %1392  ;;  %v1185_v46 = vpack.c.bf16 %v827_v60, %v827_v60  ;;  %v830_v50 = vmul.f32 %v1391_v38, %v1711_v19 }
 0x13e   : > { %v1395_v51 = vpop.eup %1394  ;;  %972 = vst.msk [vmem:[%s1629_s30 + $0x30] sm:$0xf] %vm959_vm2, %v1169_v43  ;;  %v1172_v2 = vpack.c.bf16 %v814_v49, %v814_v49  ;;  %v812_v21 = vmul.f32 %v1393_v1, %v1715_v31 }
 0x13f   : > { %988 = vst.msk [vmem:[%s1629_s30 + $0x70] sm:$0xf] %vm959_vm2, %v1185_v46  ;;  %v1188_v11 = vpack.c.bf16 %v830_v50, %v830_v50  ;;  %v828_v20 = vmul.f32 %v1395_v51, %v1719_v42 }
 0x140   : > { %975 = vst.msk [vmem:[%s1629_s30 + $0x3c] sm:$0xf] %vm959_vm2, %v1172_v2  ;;  %v1170_v29 = vpack.c.bf16 %v812_v21, %v812_v21 }
 0x141   : > { %991 = vst.msk [vmem:[%s1629_s30 + $0x7c] sm:$0xf] %vm959_vm2, %v1188_v11  ;;  %v1186_v27 = vpack.c.bf16 %v828_v20, %v828_v20 }
 0x142   : > { %973 = vst.msk [vmem:[%s1629_s30 + $0x34] sm:$0xf] %vm959_vm2, %v1170_v29 }
 0x143   : > { %989 = vst.msk [vmem:[%s1629_s30 + $0x74] sm:$0xf] %vm959_vm2, %v1186_v27 }
 0x144 PF: > { %s14_s15 = sadd.s32 1, %s1402_s15  }
 0x145   : > { %p11_p4 = scmp.ge.s32.totalorder %s14_s15, 4  }
 0x147   :  { %13 = sbr.rel (!%p11_p4) target bundleno = 1 (0x1), region = 66 }

</bundles_post_ra>
